<compile_context>
chip_gen: v5e
topology: v5e:2x2
jax: 0.10.0
libtpu: 0.0.40
codegen_flags: <defaults>
</compile_context>

<pallas_src>
import functools

import jax
import jax.numpy as jnp
from jax.experimental import pallas as pl
from jax.experimental.pallas import tpu as pltpu

# ---- static layer config (small, consistent with the module) -------------------
B = 2          # batch
C_IN = 4       # input_dim
T = 32         # input sequence length
C_OUT = 32     # output_dim
K = 5          # kernel_size
STRIDE = 2     # stride
EPS = 1e-5     # GroupNorm eps (PyTorch default)
INV_SQRT2 = 0.7071067811865475


def _fe_layer_kernel(x_ref, w_ref, p_ref, o_ref, *, batch, t_out):
    """Whole batch in one invocation: one fused conv matmul + per-(b,c) norm + GELU.

    x_ref: (B*T_out, K*C_in)   im2col'd input slab
    w_ref: (K*C_in, C_out)     conv weight, (tap, in_ch) flattened on the contraction dim
    p_ref: (3, C_out)          packed params: row 0 = bias, 1 = gamma, 2 = beta
    o_ref: (B, T_out, C_out)
    """
    # Single MXU matmul for the whole batched convolution.
    acc = jnp.dot(x_ref[...], w_ref[...], preferred_element_type=jnp.float32)

    params = p_ref[...]                                 # (3, C_out)
    bias = params[0:1, :]
    gamma = params[1:2, :]
    beta = params[2:3, :]

    acc = acc + bias                                    # broadcast over rows (B*T_out)

    # GroupNorm with num_groups == num_channels (wav2vec2 config): per-(batch, channel)
    # normalization over the time axis (biased variance, like PyTorch). Batch is tiny
    # and static, so unroll it.
    c = acc.shape[1]
    for b in range(batch):
        yb = jax.lax.slice(acc, (b * t_out, 0), ((b + 1) * t_out, c))   # (T_out, C_out)
        mean = jnp.mean(yb, axis=0, keepdims=True)                      # (1, C_out)
        var = jnp.mean(jnp.square(yb - mean), axis=0, keepdims=True)
        yn = (yb - mean) * jax.lax.rsqrt(var + EPS)
        yn = yn * gamma + beta
        # Exact GELU (erf form), matching torch.nn.GELU() default.
        yn = 0.5 * yn * (1.0 + jax.lax.erf(yn * INV_SQRT2))
        o_ref[b] = yn.astype(o_ref.dtype)


def _im2col(x_tm, k_size, stride, t_out):
    """(B, T, C_in) -> (B, T_out, K*C_in): column index = k*C_in + c_in."""
    b_, t, c_in = x_tm.shape
    taps = [
        jax.lax.slice(x_tm, (0, k, 0), (b_, k + stride * (t_out - 1) + 1, c_in),
                      (1, stride, 1))                     # (B, T_out, C_in)
        for k in range(k_size)
    ]
    xc = jnp.stack(taps, axis=2)                          # (B, T_out, K, C_in)
    return xc.reshape(b_, t_out, k_size * c_in)


def wav2vec2_feature_extraction_layer_tm(x_tm, weight, bias, gamma, beta, *, stride=STRIDE):
    """Time-major entry point: x_tm (B, T, C_in) f32 -> (B, T_out, C_out) f32.

    Use this when chaining layers to avoid the NCL transposes entirely.
    """
    b_, t, c_in = x_tm.shape
    c_out, _, k_size = weight.shape
    t_out = (t - k_size) // stride + 1
    kc = k_size * c_in

    # Wrapper-side glue: im2col slab, flattened weight, packed per-channel params.
    x_col = _im2col(x_tm, k_size, stride, t_out).reshape(b_ * t_out, kc)   # (B*T_out, K*C_in)
    w_col = jnp.transpose(weight, (2, 1, 0)).reshape(kc, c_out)            # (K*C_in, C_out)
    params = jnp.stack([bias, gamma, beta], axis=0)                        # (3, C_out)

    return pl.pallas_call(
        functools.partial(_fe_layer_kernel, batch=b_, t_out=t_out),
        out_shape=jax.ShapeDtypeStruct((b_, t_out, c_out), x_tm.dtype),
        # No grid: single invocation, whole-array blocks resident in VMEM.
        in_specs=[
            pl.BlockSpec((b_ * t_out, kc), lambda: (0, 0)),
            pl.BlockSpec((kc, c_out), lambda: (0, 0)),
            pl.BlockSpec((3, c_out), lambda: (0, 0)),
        ],
        out_specs=pl.BlockSpec((b_, t_out, c_out), lambda: (0, 0, 0)),
    )(x_col, w_col, params)


def wav2vec2_feature_extraction_layer(x, weight, bias, gamma, beta):
    """Module-contract wrapper: x (B, C_in, T) f32 -> (B, C_out, T_out) f32 (PyTorch NCL)."""
    x_tm = jnp.transpose(x, (0, 2, 1))                                     # (B, T, C_in)
    out_tm = wav2vec2_feature_extraction_layer_tm(x_tm, weight, bias, gamma, beta)
    return jnp.transpose(out_tm, (0, 2, 1))                                # (B, C_out, T_out)


def _reference(x, weight, bias, gamma, beta):
    """Pure-JAX reference of the PyTorch forward (conv + groupnorm + exact GELU)."""
    y = jax.lax.conv_general_dilated(
        x, weight, window_strides=(STRIDE,), padding="VALID",
        dimension_numbers=("NCH", "OIH", "NCH"))
    y = y + bias[None, :, None]
    mean = jnp.mean(y, axis=2, keepdims=True)
    var = jnp.mean(jnp.square(y - mean), axis=2, keepdims=True)
    y = (y - mean) * jax.lax.rsqrt(var + EPS)
    y = y * gamma[None, :, None] + beta[None, :, None]
    return 0.5 * y * (1.0 + jax.lax.erf(y * INV_SQRT2))


if __name__ == "__main__":
    key = jax.random.PRNGKey(0)
    k_x, k_w, k_b, k_g, k_be = jax.random.split(key, 5)

    # Deterministic parameter init mirroring the module's __init__:
    #  - Wav2Vec2FeatureConv1d.reset_parameters: kaiming_normal_ (fan_in, relu gain)
    #  - Conv1d bias default: U(-1/sqrt(fan_in), 1/sqrt(fan_in))
    #  - GroupNorm affine params (perturbed from the 1/0 default to exercise them)
    fan_in = C_IN * K
    w = jax.random.normal(k_w, (C_OUT, C_IN, K), jnp.float32) * jnp.sqrt(2.0 / fan_in)
    bnd = 1.0 / jnp.sqrt(float(fan_in))
    b = jax.random.uniform(k_b, (C_OUT,), jnp.float32, -bnd, bnd)
    gamma = 1.0 + 0.1 * jax.random.normal(k_g, (C_OUT,), jnp.float32)
    beta = 0.1 * jax.random.normal(k_be, (C_OUT,), jnp.float32)

    x = jax.random.normal(k_x, (B, C_IN, T), jnp.float32)

    # TODO(synk): dropout_p=0.0 -> Dropout module is None in the reference; nothing to lower.
    out = jax.block_until_ready(wav2vec2_feature_extraction_layer(x, w, b, gamma, beta))
    ref = _reference(x, w, b, gamma, beta)

    t_out = (T - K) // STRIDE + 1
    assert out.shape == (B, C_OUT, t_out), out.shape
    # All-f32 path: tight tolerance so any future bf16 trade-off is deliberate.
    assert jnp.max(jnp.abs(out - ref)) < 1e-5, float(jnp.max(jnp.abs(out - ref)))
    print("KERNEL_OK")
</pallas_src>

<mosaic_0001>
module attributes {stable_mosaic.version = 11 : i64} {
  func.func @_fe_layer_kernel(%arg0: memref<28x20xf32, #tpu.memory_space<vmem>>, %arg1: memref<20x32xf32, #tpu.memory_space<vmem>>, %arg2: memref<3x32xf32, #tpu.memory_space<vmem>>, %arg3: memref<2x14x32xf32, #tpu.memory_space<vmem>>) attributes {dimension_semantics = [], scalar_prefetch = 0 : i64, scratch_operands = 0 : i64, tpu.core_type = #tpu.core_type<tc>} {
    %c0 = arith.constant 0 : index
    %c0_0 = arith.constant 0 : index
    %0 = vector.load %arg0[%c0, %c0_0] : memref<28x20xf32, #tpu.memory_space<vmem>>, vector<28x20xf32>
    %c0_1 = arith.constant 0 : index
    %c0_2 = arith.constant 0 : index
    %1 = vector.load %arg1[%c0_1, %c0_2] : memref<20x32xf32, #tpu.memory_space<vmem>>, vector<20x32xf32>
    %cst = arith.constant dense<0.000000e+00> : vector<28x32xf32>
    %2 = tpu.matmul %0, %1, %cst {dimension_numbers = #tpu.dot_dimension_numbers<[1], [0], [0], [1], [0, 0, 1, 1], [], []>} : vector<28x20xf32>, vector<20x32xf32>, vector<28x32xf32> -> vector<28x32xf32>
    %c0_3 = arith.constant 0 : index
    %c0_4 = arith.constant 0 : index
    %3 = vector.load %arg2[%c0_3, %c0_4] : memref<3x32xf32, #tpu.memory_space<vmem>>, vector<3x32xf32>
    %4 = vector.extract_strided_slice %3 {offsets = [0, 0], sizes = [1, 32], strides = [1, 1]} : vector<3x32xf32> to vector<1x32xf32>
    %5 = vector.extract_strided_slice %3 {offsets = [1, 0], sizes = [1, 32], strides = [1, 1]} : vector<3x32xf32> to vector<1x32xf32>
    %6 = vector.extract_strided_slice %3 {offsets = [2, 0], sizes = [1, 32], strides = [1, 1]} : vector<3x32xf32> to vector<1x32xf32>
    %7 = vector.broadcast %4 : vector<1x32xf32> to vector<28x32xf32>
    %8 = arith.addf %2, %7 : vector<28x32xf32>
    %9 = vector.extract_strided_slice %8 {offsets = [0, 0], sizes = [14, 32], strides = [1, 1]} : vector<28x32xf32> to vector<14x32xf32>
    %cst_5 = arith.constant dense<0.000000e+00> : vector<32xf32>
    %10 = vector.multi_reduction <add>, %9, %cst_5 [0] : vector<14x32xf32> to vector<32xf32>
    %11 = vector.shape_cast %10 : vector<32xf32> to vector<1x32xf32>
    %cst_6 = arith.constant 1.400000e+01 : f32
    %12 = vector.broadcast %cst_6 : f32 to vector<1x32xf32>
    %13 = arith.divf %11, %12 : vector<1x32xf32>
    %14 = vector.broadcast %13 : vector<1x32xf32> to vector<14x32xf32>
    %15 = arith.subf %9, %14 : vector<14x32xf32>
    %16 = arith.mulf %15, %15 : vector<14x32xf32>
    %cst_7 = arith.constant dense<0.000000e+00> : vector<32xf32>
    %17 = vector.multi_reduction <add>, %16, %cst_7 [0] : vector<14x32xf32> to vector<32xf32>
    %18 = vector.shape_cast %17 : vector<32xf32> to vector<1x32xf32>
    %cst_8 = arith.constant 1.400000e+01 : f32
    %19 = vector.broadcast %cst_8 : f32 to vector<1x32xf32>
    %20 = arith.divf %18, %19 : vector<1x32xf32>
    %21 = vector.broadcast %13 : vector<1x32xf32> to vector<14x32xf32>
    %22 = arith.subf %9, %21 : vector<14x32xf32>
    %cst_9 = arith.constant 9.99999974E-6 : f32
    %23 = vector.broadcast %cst_9 : f32 to vector<1x32xf32>
    %24 = arith.addf %20, %23 : vector<1x32xf32>
    %25 = math.rsqrt %24 : vector<1x32xf32>
    %26 = vector.broadcast %25 : vector<1x32xf32> to vector<14x32xf32>
    %27 = arith.mulf %22, %26 : vector<14x32xf32>
    %28 = vector.broadcast %5 : vector<1x32xf32> to vector<14x32xf32>
    %29 = arith.mulf %27, %28 : vector<14x32xf32>
    %30 = vector.broadcast %6 : vector<1x32xf32> to vector<14x32xf32>
    %31 = arith.addf %29, %30 : vector<14x32xf32>
    %cst_10 = arith.constant 5.000000e-01 : f32
    %32 = vector.broadcast %cst_10 : f32 to vector<14x32xf32>
    %33 = arith.mulf %32, %31 : vector<14x32xf32>
    %cst_11 = arith.constant 0.707106769 : f32
    %34 = vector.broadcast %cst_11 : f32 to vector<14x32xf32>
    %35 = arith.mulf %31, %34 : vector<14x32xf32>
    %36 = math.erf %35 : vector<14x32xf32>
    %cst_12 = arith.constant 1.000000e+00 : f32
    %37 = vector.broadcast %cst_12 : f32 to vector<14x32xf32>
    %38 = arith.addf %37, %36 : vector<14x32xf32>
    %39 = arith.mulf %33, %38 : vector<14x32xf32>
    %c0_13 = arith.constant 0 : index
    %c0_14 = arith.constant 0 : index
    %c0_15 = arith.constant 0 : index
    %40 = vector.load %arg3[%c0_13, %c0_14, %c0_15] : memref<2x14x32xf32, #tpu.memory_space<vmem>>, vector<1x14x32xf32>
    %41 = vector.shape_cast %40 : vector<1x14x32xf32> to vector<14x32xf32>
    %42 = vector.shape_cast %39 : vector<14x32xf32> to vector<1x14x32xf32>
    tpu.vector_store %arg3[%c0_13, %c0_14, %c0_15], %42 {strides = array<i32>} : memref<2x14x32xf32, #tpu.memory_space<vmem>>, vector<1x14x32xf32>,
    %43 = vector.extract_strided_slice %8 {offsets = [14, 0], sizes = [14, 32], strides = [1, 1]} : vector<28x32xf32> to vector<14x32xf32>
    %cst_16 = arith.constant dense<0.000000e+00> : vector<32xf32>
    %44 = vector.multi_reduction <add>, %43, %cst_16 [0] : vector<14x32xf32> to vector<32xf32>
    %45 = vector.shape_cast %44 : vector<32xf32> to vector<1x32xf32>
    %cst_17 = arith.constant 1.400000e+01 : f32
    %46 = vector.broadcast %cst_17 : f32 to vector<1x32xf32>
    %47 = arith.divf %45, %46 : vector<1x32xf32>
    %48 = vector.broadcast %47 : vector<1x32xf32> to vector<14x32xf32>
    %49 = arith.subf %43, %48 : vector<14x32xf32>
    %50 = arith.mulf %49, %49 : vector<14x32xf32>
    %cst_18 = arith.constant dense<0.000000e+00> : vector<32xf32>
    %51 = vector.multi_reduction <add>, %50, %cst_18 [0] : vector<14x32xf32> to vector<32xf32>
    %52 = vector.shape_cast %51 : vector<32xf32> to vector<1x32xf32>
    %cst_19 = arith.constant 1.400000e+01 : f32
    %53 = vector.broadcast %cst_19 : f32 to vector<1x32xf32>
    %54 = arith.divf %52, %53 : vector<1x32xf32>
    %55 = vector.broadcast %47 : vector<1x32xf32> to vector<14x32xf32>
    %56 = arith.subf %43, %55 : vector<14x32xf32>
    %cst_20 = arith.constant 9.99999974E-6 : f32
    %57 = vector.broadcast %cst_20 : f32 to vector<1x32xf32>
    %58 = arith.addf %54, %57 : vector<1x32xf32>
    %59 = math.rsqrt %58 : vector<1x32xf32>
    %60 = vector.broadcast %59 : vector<1x32xf32> to vector<14x32xf32>
    %61 = arith.mulf %56, %60 : vector<14x32xf32>
    %62 = vector.broadcast %5 : vector<1x32xf32> to vector<14x32xf32>
    %63 = arith.mulf %61, %62 : vector<14x32xf32>
    %64 = vector.broadcast %6 : vector<1x32xf32> to vector<14x32xf32>
    %65 = arith.addf %63, %64 : vector<14x32xf32>
    %cst_21 = arith.constant 5.000000e-01 : f32
    %66 = vector.broadcast %cst_21 : f32 to vector<14x32xf32>
    %67 = arith.mulf %66, %65 : vector<14x32xf32>
    %cst_22 = arith.constant 0.707106769 : f32
    %68 = vector.broadcast %cst_22 : f32 to vector<14x32xf32>
    %69 = arith.mulf %65, %68 : vector<14x32xf32>
    %70 = math.erf %69 : vector<14x32xf32>
    %cst_23 = arith.constant 1.000000e+00 : f32
    %71 = vector.broadcast %cst_23 : f32 to vector<14x32xf32>
    %72 = arith.addf %71, %70 : vector<14x32xf32>
    %73 = arith.mulf %67, %72 : vector<14x32xf32>
    %c1 = arith.constant 1 : index
    %c0_24 = arith.constant 0 : index
    %c0_25 = arith.constant 0 : index
    %74 = vector.load %arg3[%c1, %c0_24, %c0_25] : memref<2x14x32xf32, #tpu.memory_space<vmem>>, vector<1x14x32xf32>
    %75 = vector.shape_cast %74 : vector<1x14x32xf32> to vector<14x32xf32>
    %76 = vector.shape_cast %73 : vector<14x32xf32> to vector<1x14x32xf32>
    tpu.vector_store %arg3[%c1, %c0_24, %c0_25], %76 {strides = array<i32>} : memref<2x14x32xf32, #tpu.memory_space<vmem>>, vector<1x14x32xf32>,
    return
  }
}

</mosaic_0001>

<bundles_post_ra>
// kernel: tpu_custom_call.1
= control target key start
LH: loop header
LB: loop body
LE: loop exit
PB: predicated region body
PF: predicated region fallthrough
CT: control target
= control target key end

     0   :  { %vm36_vm0 = vcmask 1043456   ;;  %vm23_vm1 = vcmask 162816   ;;  %v459_v7 = vmov 14.0   ;;  %vm69_vm2 = vcmask 261120   ;;  %s651_s1 = inlined_call_operand.vmem [shape: f32[20,32], index: 1, kind: input, shape index: {}]   ;;  %s652_s0 = inlined_call_operand.vmem [shape: f32[28,20], index: 0, kind: input, shape index: {}]   ;;  %s653_s2 = inlined_call_operand.vmem [shape: f32[3,32], index: 2, kind: input, shape index: {}]   ;;  %s654_s3 = inlined_call_operand.vmem [shape: f32[2,14,32], index: 3, kind: output, shape index: {}]  }
   0x1   :  { %v20_v0 = vld [vmem:[%s651_s1 + $0x10] sm:$0xf]  ;;  %v19_v1 = vld [vmem:[%s651_s1 + $0x8] sm:$0xff]  ;;  %v18_v2 = vld [vmem:[%s651_s1] sm:$0xff]  ;;  %443 = vrcp.f32 %v459_v7  ;;  %vm71_vm3 = vcmask 259072   ;;  %vm214_vm4 = vcmask 1041408  }
   0x2   :  { %420 = vmatpush.msk.msra.mxu0 %vm36_vm0, %v20_v0  ;;  %433 = vmatpush.msk.msra.mxu1 %vm36_vm0, %v20_v0  ;;  %v14_v3 = vld [vmem:[%s652_s0] sm:$0xff]  ;;  %v15_v4 = vld [vmem:[%s652_s0 + $0x8] sm:$0xff]  ;;  %v16_v5 = vld [vmem:[%s652_s0 + $0x10] sm:$0xff] }
   0x3   :  { %434 = vmatpush.msk.msra.mxu2 %vm36_vm0, %v20_v0  ;;  %435 = vmatpush.msk.msra.mxu3 %vm36_vm0, %v20_v0  ;;  %v17_v6 = vld [vmem:[%s652_s0 + $0x18] sm:$0xf]  ;;  %v504_v8 = vld [vmem:[%s653_s2] sm:$0x7] }
   0x4   :  { %54 = vmatpush.msra.mxu0 %v19_v1  ;;  %436 = vmatpush.msra.mxu1 %v19_v1  ;;  %v22_v10 = vperm.slane %v504_v8, 0 }
   0x5   :  { %437 = vmatpush.msra.mxu2 %v19_v1  ;;  %438 = vmatpush.msra.mxu3 %v19_v1 }
   0x6   :  { %55 = vmatpush.msra.mxu0 %v18_v2  ;;  %439 = vmatpush.msra.mxu1 %v18_v2 }
   0x7   :  { %440 = vmatpush.msra.mxu2 %v18_v2  ;;  %441 = vmatpush.msra.mxu3 %v18_v2  ;;  %v444_v9 = vpop.eup %443 }
   0x8   :  { %421 = vmatmul.msk.f32.vlgmr.msra.gmra.mxu0 %vm23_vm1, %v14_v3  ;;  %422 = vmatmul.msk.f32.vlgmr.msra.gmra.mxu1 %vm23_vm1, %v15_v4  ;;  %v81_v11 = vmul.f32 14.0, %v444_v9  ;;  %vm85_vm5 = vweird.f32 %v444_v9 }
   0x9   :  { %423 = vmatmul.msk.f32.vlgmr.msra.gmra.mxu2 %vm23_vm1, %v16_v5  ;;  %424 = vmatmul.msk.f32.vlgmr.msra.gmra.mxu3 %vm23_vm1, %v17_v6 }
   0xa   :  { %v82_v18 = vsub.f32 1.0, %v81_v11 }
   0xc   :  { %v83_v21 = vmul.f32 %v444_v9, %v82_v18 }
   0xe   :  { %v84_v31 = vadd.f32 %v444_v9, %v83_v21 }
  0x10   :  { %v86_v39 = vsel %vm85_vm5, %v444_v9, %v84_v31  ;;  %v118_v31 = vperm.slane %v504_v8, 2 }
  0x85   :  { %v57_v12 = vpop.f32.mrf.mxu0  ;;  %v60_v13 = vpop.f32.mrf.mxu1 }
  0x86   :  { %v58_v14 = vadd.f32 %v57_v12, %v22_v10  ;;  %v61_v15 = vadd.f32 %v60_v13, %v22_v10 }
  0x88   :  { %v70_v16 = vsel %vm69_vm2, %v58_v14, 0.0  ;;  %v72_v17 = vsel %vm71_vm3, %v61_v15, 0.0  ;;  %v215_v25 = vrot.slane %v61_v15, 6 }
  0x89   :  { %v73_v19 = vadd.f32 %v72_v17, %v70_v16 }
  0x8b   :  { %v74_v20 = vrot.slane %v73_v19, 4 }
  0x8c   :  { %v63_v22 = vpop.f32.mrf.mxu2  ;;  %v66_v23 = vpop.f32.mrf.mxu3 }
  0x8d   :  { %v75_v24 = vadd.f32 %v74_v20, %v73_v19  ;;  %v64_v26 = vadd.f32 %v63_v22, %v22_v10  ;;  %v67_v27 = vadd.f32 %v66_v23, %v22_v10 }
  0x8f   :  { %v76_v28 = vrot.slane %v75_v24, 2  ;;  %v216_v29 = vrot.slane %v64_v26, 6  ;;  %v218_v30 = vrot.slane %v67_v27, 6 }
  0x91   :  { %v77_v32 = vadd.f32 %v76_v28, %v75_v24  ;;  %v217_v33 = vsel %vm214_vm4, %v215_v25, %v216_v29  ;;  %v219_v34 = vsel %vm214_vm4, %v216_v29, %v218_v30  ;;  %v115_v29 = vperm.slane %v504_v8, 1 }
  0x92   :  { %v222_v35 = vsel %vm69_vm2, %v217_v33, 0.0  ;;  %v223_v36 = vsel %vm71_vm3, %v219_v34, 0.0 }
  0x93   :  { %v78_v37 = vrot.slane %v77_v32, 1  ;;  %v224_v38 = vadd.f32 %v223_v36, %v222_v35 }
  0x95   :  { %v79_v40 = vadd.f32 %v78_v37, %v77_v32  ;;  %v225_v41 = vrot.slane %v224_v38, 4 }
  0x97   :  { %v87_v42 = vmul.f32 %v86_v39, %v79_v40  ;;  %v226_v43 = vadd.f32 %v225_v41, %v224_v38 }
  0x99   :  { %v88_v44 = vsub.f32 %v58_v14, %v87_v42  ;;  %v89_v45 = vsub.f32 %v61_v15, %v87_v42  ;;  %v227_v46 = vrot.slane %v226_v43, 2 }
  0x9b   :  { %v90_v47 = vmul.f32 %v88_v44, %v88_v44  ;;  %v91_v48 = vmul.f32 %v89_v45, %v89_v45  ;;  %v228_v49 = vadd.f32 %v227_v46, %v226_v43 }
  0x9d   :  { %v92_v50 = vsel %vm69_vm2, %v90_v47, 0.0  ;;  %v93_v51 = vsel %vm71_vm3, %v91_v48, 0.0  ;;  %v229_v52 = vrot.slane %v228_v49, 1 }
  0x9e   :  { %v94_v53 = vadd.f32 %v93_v51, %v92_v50 }
  0x9f   :  { %v230_v54 = vadd.f32 %v229_v52, %v228_v49 }
  0xa0   :  { %v95_v55 = vrot.slane %v94_v53, 4 }
  0xa1   :  { %v231_v56 = vmul.f32 %v230_v54, %v86_v39 }
  0xa2   :  { %v96_v57 = vadd.f32 %v95_v55, %v94_v53 }
  0xa3   :  { %v515_v58 = vsub.f32 %v61_v15, %v231_v56  ;;  %v517_v59 = vsub.f32 %v64_v26, %v231_v56  ;;  %v519_v60 = vsub.f32 %v67_v27, %v231_v56 }
  0xa4   :  { %v97_v61 = vrot.slane %v96_v57, 2 }
  0xa5   :  { %v235_v62 = vmul.f32 %v515_v58, %v515_v58  ;;  %v236_v63 = vmul.f32 %v517_v59, %v517_v59  ;;  %v237_v0 = vmul.f32 %v519_v60, %v519_v60 }
  0xa6   :  { %v98_v1 = vadd.f32 %v97_v61, %v96_v57 }
  0xa7   :  { %v241_v2 = vrot.slane %v235_v62, 6  ;;  %v242_v3 = vrot.slane %v236_v63, 6  ;;  %v244_v4 = vrot.slane %v237_v0, 6 }
  0xa8   :  { %v99_v5 = vrot.slane %v98_v1, 1 }
  0xa9   :  { %v243_v6 = vsel %vm214_vm4, %v241_v2, %v242_v3  ;;  %v245_v7 = vsel %vm214_vm4, %v242_v3, %v244_v4 }
  0xaa   :  { %v100_v9 = vadd.f32 %v99_v5, %v98_v1  ;;  %v248_v10 = vsel %vm69_vm2, %v243_v6, 0.0  ;;  %v249_v11 = vsel %vm71_vm3, %v245_v7, 0.0 }
  0xab   :  { %v250_v12 = vadd.f32 %v249_v11, %v248_v10 }
  0xac   :  { %v101_v13 = vmul.f32 %v100_v9, %v86_v39 }
  0xad   :  { %v251_v14 = vrot.slane %v250_v12, 4 }
  0xae   :  { %v102_v15 = vadd.f32 1e-05, %v101_v13 }
  0xaf   :  { %v252_v16 = vadd.f32 %v251_v14, %v250_v12 }
  0xb0   :  { %445 = vrsqrt.f32 %v102_v15  ;;  %vm109_vm7 = vweird.f32 %v102_v15 }
  0xb1   :  { %v253_v17 = vrot.slane %v252_v16, 2 }
  0xb3   :  { %v254_v18 = vadd.f32 %v253_v17, %v252_v16 }
  0xb5   :  { %v255_v19 = vrot.slane %v254_v18, 1 }
  0xb6   :  { %v446_v20 = vpop.eup %445 }
  0xb7   :  { %v104_v21 = vmul.f32 %v446_v20, %v102_v15  ;;  %v256_v22 = vadd.f32 %v255_v19, %v254_v18  ;;  %vm110_vm6 = vweird.f32 %v446_v20 }
  0xb8   :  { %vm111_vm8 = vmor %vm109_vm7, %vm110_vm6 }
  0xb9   :  { %v105_v23 = vmul.f32 %v446_v20, %v104_v21  ;;  %v257_v24 = vmul.f32 %v256_v22, %v86_v39 }
  0xbb   :  { %v106_v25 = vmul.f32 0.5, %v105_v23  ;;  %v258_v26 = vadd.f32 1e-05, %v257_v24 }
  0xbd   :  { %v107_v27 = vsub.f32 1.5, %v106_v25  ;;  %447 = vrsqrt.f32 %v258_v26  ;;  %vm265_vm10 = vweird.f32 %v258_v26 }
  0xbf   :  { %v108_v28 = vmul.f32 %v446_v20, %v107_v27 }
  0xc1   :  { %v112_v30 = vsel %vm111_vm8, %v446_v20, %v108_v28 }
  0xc2   :  { %v113_v32 = vmul.f32 %v112_v30, %v88_v44  ;;  %v114_v33 = vmul.f32 %v112_v30, %v89_v45 }
  0xc3   :  { %v448_v34 = vpop.eup %447 }
  0xc4   :  { %v116_v35 = vmul.f32 %v115_v29, %v113_v32  ;;  %v117_v36 = vmul.f32 %v115_v29, %v114_v33  ;;  %v260_v37 = vmul.f32 %v448_v34, %v258_v26  ;;  %vm266_vm9 = vweird.f32 %v448_v34 }
  0xc5   :  { %vm267_vm11 = vmor %vm265_vm10, %vm266_vm9 }
  0xc6   :  { %v533_v38 = vadd.f32 %v118_v31, %v116_v35  ;;  %v535_v39 = vadd.f32 %v118_v31, %v117_v36  ;;  %v261_v40 = vmul.f32 %v448_v34, %v260_v37 }
  0xc8   :  { %v538_v41 = vmul.f32 0.70710677, %v533_v38  ;;  %v541_v42 = vmul.f32 0.70710677, %v535_v39  ;;  %v262_v43 = vmul.f32 0.5, %v261_v40 }
  0xca   :  { %v125_v8 = vmul.f32 %v538_v41, %v538_v41  ;;  %v165_v44 = vmul.f32 %v541_v42, %v541_v42  ;;  %v263_v45 = vsub.f32 1.5, %v262_v43 }
  0xcc   :  { %v126_v46 = vmin.f32 %v125_v8, 16.0  ;;  %v166_v47 = vmin.f32 %v165_v44, 16.0  ;;  %v264_v48 = vmul.f32 %v448_v34, %v263_v45 }
  0xce   :  { %v127_v49 = vmul.f32 2.1237322e-06, %v126_v46  ;;  %v138_v50 = vmul.f32 3.8918573e-05, %v126_v46  ;;  %v167_v51 = vmul.f32 2.1237322e-06, %v166_v47  ;;  %v268_v53 = vsel %vm267_vm11, %v448_v34, %v264_v48 }
  0xcf   :  { %v178_v52 = vmul.f32 3.8918573e-05, %v166_v47  ;;  %v269_v57 = vmul.f32 %v268_v53, %v515_v58  ;;  %v270_v62 = vmul.f32 %v268_v53, %v517_v59  ;;  %v271_v4 = vmul.f32 %v268_v53, %v519_v60 }
  0xd0   :  { %v128_v54 = vadd.f32 0.00028619796, %v127_v49  ;;  %v139_v55 = vadd.f32 0.001143296, %v138_v50  ;;  %v168_v56 = vadd.f32 0.00028619796, %v167_v51 }
  0xd1   :  { %v179_v61 = vadd.f32 0.001143296, %v178_v52  ;;  %v272_v2 = vmul.f32 %v269_v57, %v115_v29  ;;  %v273_v5 = vmul.f32 %v270_v62, %v115_v29  ;;  %v274_v15 = vmul.f32 %v271_v4, %v115_v29 }
  0xd2   :  { %v129_v63 = vmul.f32 %v128_v54, %v126_v46  ;;  %v140_v0 = vmul.f32 %v139_v55, %v126_v46  ;;  %v169_v1 = vmul.f32 %v168_v56, %v166_v47 }
  0xd3   :  { %v180_v3 = vmul.f32 %v179_v61, %v166_v47  ;;  %v550_v10 = vadd.f32 %v272_v2, %v118_v31  ;;  %v552_v12 = vadd.f32 %v273_v5, %v118_v31  ;;  %v562_v26 = vadd.f32 %v274_v15, %v118_v31 }
  0xd4   :  { %v130_v6 = vadd.f32 0.0036580483, %v129_v63  ;;  %v141_v7 = vadd.f32 0.014752088, %v140_v0  ;;  %v170_v9 = vadd.f32 0.0036580483, %v169_v1 }
  0xd5   :  { %v181_v11 = vadd.f32 0.014752088, %v180_v3  ;;  %v555_v16 = vmul.f32 0.70710677, %v550_v10  ;;  %v558_v20 = vmul.f32 0.70710677, %v552_v12 }
  0xd6   :  { %v131_v58 = vmul.f32 %v130_v6, %v126_v46  ;;  %v142_v13 = vmul.f32 %v141_v7, %v126_v46  ;;  %v171_v14 = vmul.f32 %v170_v9, %v166_v47  ;;  %v573_v31 = vmul.f32 0.70710677, %v562_v26 }
  0xd7   :  { %v182_v59 = vmul.f32 %v181_v11, %v166_v47  ;;  %v284_v21 = vmul.f32 %v555_v16, %v555_v16  ;;  %v324_v28 = vmul.f32 %v558_v20, %v558_v20 }
  0xd8   :  { %v132_v17 = vadd.f32 0.05243302, %v131_v58  ;;  %v143_v18 = vadd.f32 0.112945676, %v142_v13  ;;  %v172_v60 = vadd.f32 0.05243302, %v171_v14  ;;  %v364_v53 = vmul.f32 %v573_v31, %v573_v31 }
  0xd9   :  { %v183_v19 = vadd.f32 0.112945676, %v182_v59  ;;  %v564_v27 = vmin.f32 %v284_v21, 16.0  ;;  %v570_v37 = vmin.f32 %v324_v28, 16.0 }
  0xda   :  { %v133_v22 = vmul.f32 %v132_v17, %v126_v46  ;;  %v144_v23 = vmul.f32 %v143_v18, %v126_v46  ;;  %v173_v24 = vmul.f32 %v172_v60, %v166_v47  ;;  %v586_v0 = vmin.f32 %v364_v53, 16.0 }
  0xdb   :  { %v184_v25 = vmul.f32 %v183_v19, %v166_v47  ;;  %v286_v34 = vmul.f32 2.1237322e-06, %v564_v27  ;;  %v297_v35 = vmul.f32 3.8918573e-05, %v564_v27  ;;  %v326_v52 = vmul.f32 2.1237322e-06, %v570_v37 }
  0xdc   :  { %v134_v29 = vadd.f32 0.18741608, %v133_v22  ;;  %v145_v30 = vadd.f32 0.4994258, %v144_v23  ;;  %v174_v32 = vadd.f32 0.18741608, %v173_v24 }
  0xdd   :  { %v185_v33 = vadd.f32 0.4994258, %v184_v25  ;;  %v287_v43 = vadd.f32 0.00028619796, %v286_v34  ;;  %v298_v8 = vadd.f32 0.001143296, %v297_v35 }
  0xde   :  { %v146_v36 = vmul.f32 %v145_v30, %v126_v46  ;;  %v135_v44 = vmul.f32 %v134_v29, %v126_v46  ;;  %v175_v48 = vmul.f32 %v174_v32, %v166_v47  ;;  %v327_v57 = vadd.f32 0.00028619796, %v326_v52 }
  0xdf   :  { %v186_v40 = vmul.f32 %v185_v33, %v166_v47  ;;  %v288_v50 = vmul.f32 %v287_v43, %v564_v27  ;;  %v299_v51 = vmul.f32 %v298_v8, %v564_v27  ;;  %v337_v61 = vmul.f32 3.8918573e-05, %v570_v37 }
  0xe0   :  { %v147_v45 = vadd.f32 1.0, %v146_v36  ;;  %v136_v54 = vadd.f32 1.1283791, %v135_v44  ;;  %v176_v56 = vadd.f32 1.1283791, %v175_v48  ;;  %v328_v3 = vmul.f32 %v327_v57, %v570_v37 }
  0xe1   :  { %v575_v49 = vadd.f32 1.0, %v186_v40  ;;  %v289_v55 = vadd.f32 0.0036580483, %v288_v50  ;;  %v300_v46 = vadd.f32 0.014752088, %v299_v51 }
  0xe2   :  { %449 = vrcp.f32 %v147_v45  ;;  %v157_v47 = vand.u32 2147483647, %v147_v45  ;;  %v137_v2 = vmul.f32 %v136_v54, %v538_v41  ;;  %vm153_vm12 = vweird.f32 %v147_v45 }
  0xe3   :  { %451 = vrcp.f32 %v575_v49  ;;  %v290_v62 = vmul.f32 %v289_v55, %v564_v27  ;;  %v301_v63 = vmul.f32 %v300_v46, %v564_v27  ;;  %v338_v4 = vadd.f32 0.001143296, %v337_v61 }
  0xe4   :  { %v159_v7 = vand.u32 2147483648, %v147_v45  ;;  %v177_v9 = vmul.f32 %v176_v56, %v541_v42  ;;  %vm591_vm13 = vcmp.eq.f32.partialorder %v157_v47, 8.507059e+37  ;;  %vm193_vm14 = vweird.f32 %v575_v49 }
  0xe5   :  { %v302_v11 = vadd.f32 0.112945676, %v301_v63  ;;  %v339_v41 = vmul.f32 %v338_v4, %v570_v37  ;;  %v291_v59 = vadd.f32 0.05243302, %v290_v62  ;;  %v377_v17 = vmul.f32 3.8918573e-05, %v586_v0 }
  0xe6   :  { %v199_v42 = vand.u32 2147483648, %v575_v49  ;;  %v329_v60 = vadd.f32 0.0036580483, %v328_v3  ;;  %v366_v23 = vmul.f32 2.1237322e-06, %v586_v0  ;;  %v160_v30 = vor.u32 1.1754944e-38, %v159_v7 }
  0xe7   :  { %v303_v15 = vmul.f32 %v302_v11, %v564_v27  ;;  %v340_v19 = vadd.f32 0.014752088, %v339_v41  ;;  %v197_v25 = vand.u32 2147483647, %v575_v49  ;;  %v378_v33 = vadd.f32 0.001143296, %v377_v17 }
  0xe8   :  { %v450_v1 = vpop.eup %449  ;;  %v292_v35 = vmul.f32 %v291_v59, %v564_v27  ;;  %v330_v36 = vmul.f32 %v329_v60, %v570_v37  ;;  %v200_v8 = vor.u32 1.1754944e-38, %v199_v42  ;;  %v367_v48 = vadd.f32 0.00028619796, %v366_v23 }
  0xe9   :  { %v452_v5 = vpop.eup %451  ;;  %v149_v6 = vmul.f32 %v450_v1, %v147_v45  ;;  %vm154_vm15 = vweird.f32 %v450_v1  ;;  %v304_v22 = vadd.f32 0.4994258, %v303_v15  ;;  %v341_v28 = vmul.f32 %v340_v19, %v570_v37 }
  0xea   :  { %v189_v13 = vmul.f32 %v452_v5, %v575_v49  ;;  %vm194_vm0 = vweird.f32 %v452_v5  ;;  %vm155_vm1 = vmor %vm153_vm12, %vm154_vm15  ;;  %vm198_vm5 = vcmp.eq.f32.partialorder %v197_v25, 8.507059e+37  ;;  %v379_v54 = vmul.f32 %v378_v33, %v586_v0 }
  0xeb   :  { %v150_v14 = vsub.f32 1.0, %v149_v6  ;;  %v305_v32 = vmul.f32 %v304_v22, %v564_v27  ;;  %v342_v40 = vadd.f32 0.112945676, %v341_v28  ;;  %vm195_vm4 = vmor %vm193_vm14, %vm194_vm0  ;;  %v293_v56 = vadd.f32 0.18741608, %v292_v35 }
  0xec   :  { %v190_v18 = vsub.f32 1.0, %v189_v13  ;;  %v331_v46 = vadd.f32 0.05243302, %v330_v36  ;;  %v368_v47 = vmul.f32 %v367_v48, %v586_v0  ;;  %v121_v62 = vmul.f32 0.5, %v533_v38 }
  0xed   :  { %v151_v21 = vmul.f32 %v450_v1, %v150_v14  ;;  %v306_v44 = vadd.f32 1.0, %v305_v32  ;;  %v343_v45 = vmul.f32 %v342_v40, %v570_v37  ;;  %v380_v3 = vadd.f32 0.014752088, %v379_v54 }
  0xee   :  { %v191_v24 = vmul.f32 %v452_v5, %v190_v18  ;;  %v332_v6 = vmul.f32 %v331_v46, %v570_v37  ;;  %v369_v58 = vadd.f32 0.0036580483, %v368_v47  ;;  %vm411_vm12 = vcmask 261126  }
  0xef   :  { %v152_v29 = vadd.f32 %v450_v1, %v151_v21  ;;  %453 = vrcp.f32 %v306_v44  ;;  %v344_v57 = vadd.f32 0.4994258, %v343_v45  ;;  %v381_v13 = vmul.f32 %v380_v3, %v586_v0 }
  0xf0   :  { %v192_v34 = vadd.f32 %v452_v5, %v191_v24  ;;  %v318_v59 = vand.u32 2147483648, %v306_v44  ;;  %v333_v15 = vadd.f32 0.18741608, %v332_v6  ;;  %v370_v17 = vmul.f32 %v369_v58, %v586_v0 }
  0xf1   :  { %v156_v43 = vsel %vm155_vm1, %v450_v1, %v152_v29  ;;  %v345_v1 = vmul.f32 %v344_v57, %v570_v37  ;;  %v316_v42 = vand.u32 2147483647, %v306_v44  ;;  %vm312_vm7 = vweird.f32 %v306_v44 }
  0xf2   :  { %v161_v50 = vsel %vm591_vm13, %v160_v30, %v156_v43  ;;  %v196_v51 = vsel %vm195_vm4, %v452_v5, %v192_v34  ;;  %v294_v5 = vmul.f32 %v293_v56, %v564_v27  ;;  %v319_v24 = vor.u32 1.1754944e-38, %v318_v59 }
  0xf3   :  { %v162_v52 = vmul.f32 %v161_v50, %v137_v2  ;;  %v201_v53 = vsel %vm198_vm5, %v200_v8, %v196_v51  ;;  %v122_v2 = vmul.f32 0.5, %v535_v39  ;;  %v346_v11 = vadd.f32 1.0, %v345_v1 }
  0xf4   :  { %v202_v55 = vmul.f32 %v201_v53, %v177_v9  ;;  %v382_v39 = vadd.f32 0.112945676, %v381_v13  ;;  %v295_v27 = vadd.f32 1.1283791, %v294_v5  ;;  %v334_v25 = vmul.f32 %v333_v15, %v570_v37 }
  0xf5   :  { %v425_v49 = vclamps-f32 %v162_v52, 1.0  ;;  %v454_v7 = vpop.eup %453  ;;  %455 = vrcp.f32 %v346_v11  ;;  %v371_v28 = vadd.f32 0.05243302, %v370_v17  ;;  %v356_v43 = vand.u32 2147483647, %v346_v11 }
  0xf6   :  { %v426_v61 = vclamps-f32 %v202_v55, 1.0  ;;  %v308_v14 = vmul.f32 %v454_v7, %v306_v44  ;;  %vm313_vm6 = vweird.f32 %v454_v7  ;;  %v383_v60 = vmul.f32 %v382_v39, %v586_v0 }
  0xf7   :  { %v205_v63 = vadd.f32 1.0, %v425_v49  ;;  %v296_v23 = vmul.f32 %v295_v27, %v555_v16  ;;  %vm314_vm8 = vmor %vm312_vm7, %vm313_vm6  ;;  %v335_v40 = vadd.f32 1.1283791, %v334_v25  ;;  %v358_v8 = vand.u32 2147483648, %v346_v11 }
  0xf8   :  { %v206_v4 = vadd.f32 1.0, %v426_v61  ;;  %v309_v38 = vsub.f32 1.0, %v308_v14  ;;  %v384_v21 = vadd.f32 0.4994258, %v383_v60  ;;  %v372_v44 = vmul.f32 %v371_v28, %v586_v0 }
  0xf9   :  { %v207_v9 = vmul.f32 %v205_v63, %v121_v62  ;;  %v278_v37 = vmul.f32 0.5, %v550_v10  ;;  %vm352_vm10 = vweird.f32 %v346_v11  ;;  %v359_v45 = vor.u32 1.1754944e-38, %v358_v8 }
  0xfa   :  { %v208_v41 = vmul.f32 %v206_v4, %v122_v2  ;;  %v310_v18 = vmul.f32 %v454_v7, %v309_v38  ;;  %v385_v32 = vmul.f32 %v384_v21, %v586_v0  ;;  %v373_v52 = vadd.f32 0.18741608, %v372_v44 }
  0xfb   :  { %209 = vst.msk [vmem:[%s654_s3] sm:$0xff] %vm69_vm2, %v207_v9  ;;  %v456_v22 = vpop.eup %455  ;;  %v336_v53 = vmul.f32 %v335_v40, %v558_v20  ;;  %vm357_vm13 = vcmp.eq.f32.partialorder %v356_v43, 8.507059e+37  ;;  %v279_v62 = vmul.f32 0.5, %v552_v12  ;;  %v280_v58 = vmul.f32 0.5, %v562_v26 }
  0xfc   :  { %210 = vst.msk [vmem:[%s654_s3 + $0x8] sm:$0x3f] %vm71_vm3, %v208_v41  ;;  %v311_v19 = vadd.f32 %v454_v7, %v310_v18  ;;  %vm317_vm3 = vcmp.eq.f32.partialorder %v316_v42, 8.507059e+37  ;;  %v348_v30 = vmul.f32 %v456_v22, %v346_v11  ;;  %v386_v36 = vadd.f32 1.0, %v385_v32 }
  0xfd   :  { %vm353_vm9 = vweird.f32 %v456_v22  ;;  %v374_v10 = vmul.f32 %v373_v52, %v586_v0  ;;  %vm414_vm4 = vcmask 257024  }
  0xfe   :  { %v315_v29 = vsel %vm314_vm8, %v454_v7, %v311_v19  ;;  %v349_v35 = vsub.f32 1.0, %v348_v30  ;;  %457 = vrcp.f32 %v386_v36  ;;  %vm354_vm11 = vmor %vm352_vm10, %vm353_vm9  ;;  %v398_v63 = vand.u32 2147483648, %v386_v36 }
  0xff   :  { %v320_v33 = vsel %vm317_vm3, %v319_v24, %v315_v29  ;;  %v375_v20 = vadd.f32 1.1283791, %v374_v10  ;;  %v396_v2 = vand.u32 2147483647, %v386_v36  ;;  %vm392_vm15 = vweird.f32 %v386_v36 }
 0x100   :  { %v321_v34 = vmul.f32 %v320_v33, %v296_v23  ;;  %v350_v48 = vmul.f32 %v456_v22, %v349_v35  ;;  %v399_v6 = vor.u32 1.1754944e-38, %v398_v63 }
 0x101   :  { %v376_v0 = vmul.f32 %v375_v20, %v573_v31  ;;  %vm397_vm1 = vcmp.eq.f32.partialorder %v396_v2, 8.507059e+37 }
 0x102   :  { %v427_v16 = vclamps-f32 %v321_v34, 1.0  ;;  %v351_v50 = vadd.f32 %v456_v22, %v350_v48 }
 0x104   :  { %v404_v51 = vadd.f32 1.0, %v427_v16  ;;  %v355_v54 = vsel %vm354_vm11, %v456_v22, %v351_v50  ;;  %v458_v46 = vpop.eup %457 }
 0x105   :  { %v360_v56 = vsel %vm357_vm13, %v359_v45, %v355_v54  ;;  %v388_v57 = vmul.f32 %v458_v46, %v386_v36  ;;  %vm393_vm14 = vweird.f32 %v458_v46 }
 0x106   :  { %v407_v55 = vmul.f32 %v404_v51, %v278_v37  ;;  %v361_v49 = vmul.f32 %v360_v56, %v336_v53  ;;  %vm394_vm0 = vmor %vm392_vm15, %vm393_vm14 }
 0x107   :  { %v389_v61 = vsub.f32 1.0, %v388_v57 }
 0x108   :  { %430 = vst.msk [vmem:[%s654_s3 + $0xa] sm:$0xc0] %vm411_vm12, %v407_v55  ;;  %v428_v47 = vclamps-f32 %v361_v49, 1.0 }
 0x109   :  { %v390_v3 = vmul.f32 %v458_v46, %v389_v61 }
 0x10a   :  { %v405_v1 = vadd.f32 1.0, %v428_v47 }
 0x10b   :  { %v391_v5 = vadd.f32 %v458_v46, %v390_v3 }
 0x10c   :  { %v408_v4 = vmul.f32 %v405_v1, %v279_v62 }
 0x10d   :  { %v395_v7 = vsel %vm394_vm0, %v458_v46, %v391_v5 }
 0x10e   :  { %431 = vst.msk [vmem:[%s654_s3 + $0x12] sm:$0xff] %vm69_vm2, %v408_v4  ;;  %v400_v12 = vsel %vm397_vm1, %v399_v6, %v395_v7 }
 0x10f   :  { %v401_v9 = vmul.f32 %v400_v12, %v376_v0 }
 0x111   :  { %v429_v11 = vclamps-f32 %v401_v9, 1.0 }
 0x113   :  { %v406_v13 = vadd.f32 1.0, %v429_v11 }
 0x115   :  { %v409_v41 = vmul.f32 %v406_v13, %v280_v58 }
 0x117   :  { %432 = vst.msk [vmem:[%s654_s3 + $0x1a] sm:$0xf] %vm414_vm4, %v409_v41 }

</bundles_post_ra>
